<compile_context>
chip_gen: v6e
topology: v6e:2x2x1
jax: 0.10.0
libtpu: 0.0.40
codegen_flags: <defaults>
</compile_context>

<pallas_src>
import functools

import jax
import jax.numpy as jnp
from jax.experimental import pallas as pl
from jax.experimental.pallas import tpu as pltpu

_LANE = 128
_SUB = 8
_ROW_TILE_CAP = 512                    # rows (of 128 px) per grid step
_VMEM_BUDGET = 24 * 1024 * 1024        # blocks + temporaries budget (v7x-safe)
_VMEM_LIMIT = 40 * 1024 * 1024         # scoped VMEM limit (< v7x 64 MiB physical)


def _cdiv(a, b):
    return -(-a // b)


def _round_up(a, b):
    return _cdiv(a, b) * b


def _make_kernel(rows, row_tile, ragged, reduce8):
    """Builds the kernel body for a given (static) tiling configuration."""

    def kernel(pred_hm_ref, tgt_hm_ref, pred_regr_ref, tgt_regr_ref, part_ref):
        j = pl.program_id(0)

        @pl.when(j == 0)
        def _():
            part_ref[...] = jnp.zeros_like(part_ref)

        x = pred_hm_ref[...].astype(jnp.float32)        # (B, Rt, 128) logits
        tgt = tgt_hm_ref[...].astype(jnp.float32)       # (B, Rt, 128)
        pr = pred_regr_ref[...].astype(jnp.float32)     # (B, Cr, Rt, 128)
        tr = tgt_regr_ref[...].astype(jnp.float32)
        # Cr is a leading (vreg-repeat) axis -> this sum is pure VPU adds.
        abs_diff = jnp.abs(pr - tr).sum(axis=1)         # (B, Rt, 128)

        if ragged:
            # Only the last grid step has rows past `rows`; mask garbage there.
            rid = jax.lax.broadcasted_iota(jnp.int32, (row_tile, _LANE), 0)
            valid = ((j * row_tile + rid) < rows)[None]     # (1, Rt, 128)
            x = jnp.where(valid, x, -1e4)       # sigmoid -> 0, log terms -> 0
            tgt = jnp.where(valid, tgt, 0.0)
            abs_diff = jnp.where(valid, abs_diff, 0.0)

        # Stable log-sigmoid: log(sig(x)) = -softplus(-x); log(1-sig(x)) = -x - softplus(-x)
        e = jnp.exp(-jnp.abs(x))                        # EUP
        sp_negx = jnp.maximum(-x, 0.0) + jnp.log(1.0 + e)   # softplus(-x)
        log_p = -sp_negx
        log_1mp = -x - sp_negx
        pred = jnp.exp(log_p)                           # sigmoid(x), EUP (no Newton)

        pos = tgt == 1.0
        neg = tgt < 1.0      # kept (exact module semantics even if tgt > 1)
        omp = 1.0 - pred
        t = 1.0 - tgt
        neg_w = (t * t) * (t * t)                       # (1 - tgt)^4

        pos_term = jnp.where(pos, log_p * omp * omp, 0.0)
        neg_term = jnp.where(neg, log_1mp * (pred * pred) * neg_w, 0.0)
        regr_num = abs_diff * tgt

        if reduce8:
            def acc(q, val):
                # (B, Rt, 128) -> (B*Rt/8, 8, 128) -> leading-axis sum (pure VPU).
                part_ref[q] += val.reshape(-1, _SUB, _LANE).sum(axis=0)
        else:
            def acc(q, val):
                # Tiny-input path: accumulate full block, no reshape.
                part_ref[q] += val

        acc(0, pos_term)                    # positive focal sum
        acc(1, neg_term)                    # negative focal sum
        acc(2, pos.astype(jnp.float32))     # num_pos
        acc(3, regr_num)                    # regr numerator
        acc(4, tgt)                         # target heatmap sum

    return kernel


@functools.partial(jax.jit, static_argnames=("mask_loss_weight",
                                             "regr_loss_weight",
                                             "size_average"))
def center_loss(predicted_heatmap, predicted_regr, target_heatmap, target_regr,
                mask_loss_weight=1.0, regr_loss_weight=1.0, size_average=True):
    B, NC, H, W = predicted_heatmap.shape
    assert NC == 1, "kernel written for num_classes == 1"
    # TODO(synk): num_classes > 1 would need a per-class heatmap layout.
    Cr = predicted_regr.shape[1]
    HW = H * W

    pred_hm = predicted_heatmap.reshape(B, HW)
    tgt_hm = target_heatmap.reshape(B, HW)
    pred_rg = predicted_regr.reshape(B, Cr, HW)
    tgt_rg = target_regr.reshape(B, Cr, HW)

    # Lane padding ONLY if HW isn't 128-aligned (common detector maps are);
    # otherwise all wrapper reshapes are free (no HBM rewrite before the kernel).
    hw128 = _round_up(HW, _LANE)
    if hw128 != HW:
        lp = hw128 - HW
        pred_hm = jnp.pad(pred_hm, ((0, 0), (0, lp)), constant_values=-1e4)
        tgt_hm = jnp.pad(tgt_hm, ((0, 0), (0, lp)))
        pred_rg = jnp.pad(pred_rg, ((0, 0), (0, 0), (0, lp)))
        tgt_rg = jnp.pad(tgt_rg, ((0, 0), (0, 0), (0, lp)))
    rows = hw128 // _LANE

    # Row tile: as large as possible (cap 512), multiple of 8, sized so that
    # double-buffered inputs + ~full-block f32 temporaries fit the VMEM budget.
    def _isz(a):
        return jnp.dtype(a.dtype).itemsize
    bytes_per_row = _LANE * (
        2 * B * (_isz(predicted_heatmap) + _isz(target_heatmap))        # hm, dbl-buf
        + 2 * B * Cr * (_isz(predicted_regr) + _isz(target_regr))       # regr, dbl-buf
        + 4 * (12 * B + 2 * B * Cr))                                    # f32 temporaries
    budget_rows = max(_SUB, (_VMEM_BUDGET // bytes_per_row) // _SUB * _SUB)

    if rows < _SUB:
        row_tile = rows                     # full-dim block: no ragged edge
    else:
        row_tile = min(_ROW_TILE_CAP, budget_rows, (rows // _SUB) * _SUB)
    steps = _cdiv(rows, row_tile)
    ragged = steps * row_tile != rows       # only the last block is partial

    pred_hm = pred_hm.reshape(B, rows, _LANE)
    tgt_hm = tgt_hm.reshape(B, rows, _LANE)
    pred_rg = pred_rg.reshape(B, Cr, rows, _LANE)
    tgt_rg = tgt_rg.reshape(B, Cr, rows, _LANE)

    reduce8 = (B * row_tile) % _SUB == 0
    acc_shape = (5, _SUB, _LANE) if reduce8 else (5, B, row_tile, _LANE)

    hm_spec = pl.BlockSpec((B, row_tile, _LANE), lambda j: (0, j, 0))
    rg_spec = pl.BlockSpec((B, Cr, row_tile, _LANE), lambda j: (0, 0, j, 0))
    out_spec = pl.BlockSpec(acc_shape, lambda j: (0,) * len(acc_shape))

    kernel = _make_kernel(rows=rows, row_tile=row_tile, ragged=ragged,
                          reduce8=reduce8)

    parts = pl.pallas_call(
        kernel,
        out_shape=jax.ShapeDtypeStruct(acc_shape, jnp.float32),
        grid_spec=pltpu.PrefetchScalarGridSpec(
            num_scalar_prefetch=0,
            grid=(steps,),
            in_specs=[hm_spec, hm_spec, rg_spec, rg_spec],
            out_specs=out_spec,
        ),
        compiler_params=pltpu.CompilerParams(
            dimension_semantics=("arbitrary",),
            vmem_limit_bytes=_VMEM_LIMIT),
    )(pred_hm, tgt_hm, pred_rg, tgt_rg)

    sums = parts.reshape(5, -1).sum(axis=1)       # tiny epilogue reduction
    pos_sum = sums[0]
    neg_sum = sums[1]
    num_pos = sums[2]
    regr_num = sums[3]
    tgt_sum = sums[4]

    mask_loss = jnp.where(num_pos == 0,
                          -neg_sum,
                          -(pos_sum + neg_sum) / jnp.maximum(num_pos, 1.0))
    mask_loss = mask_loss * mask_loss_weight

    # Matches the reference module: divides by target_heatmap.sum() (no epsilon).
    regr_loss = (regr_num / tgt_sum) * regr_loss_weight

    loss = mask_loss + regr_loss
    if not size_average:
        loss = loss * B
    return loss, mask_loss, regr_loss


def _reference(predicted_heatmap, predicted_regr, target_heatmap, target_regr,
               mask_loss_weight=1.0, regr_loss_weight=1.0, size_average=True):
    """Pure-JAX reference mirroring the PyTorch forward (sanity check)."""
    pred = jax.nn.sigmoid(predicted_heatmap)
    gt = target_heatmap
    pos_inds = (gt == 1.0).astype(jnp.float32)
    neg_inds = (gt < 1.0).astype(jnp.float32)
    neg_weights = (1.0 - gt) ** 4
    pos_loss = (jnp.log(pred) * (1.0 - pred) ** 2 * pos_inds).sum()
    neg_loss = (jnp.log(1.0 - pred) * pred ** 2 * neg_weights * neg_inds).sum()
    num_pos = pos_inds.sum()
    mask_loss = jnp.where(num_pos == 0, -neg_loss,
                          -(pos_loss + neg_loss) / num_pos) * mask_loss_weight
    regr_loss = (jnp.abs(predicted_regr - target_regr).sum(1)[:, None, :, :]
                 * target_heatmap).sum() / target_heatmap.sum()
    regr_loss = regr_loss * regr_loss_weight
    loss = mask_loss + regr_loss
    if not size_average:
        loss = loss * predicted_heatmap.shape[0]
    return loss, mask_loss, regr_loss


if __name__ == "__main__":
    B, NC, Cr, H, W = 2, 1, 2, 16, 16

    key = jax.random.PRNGKey(0)
    k1, k2, k3, k4 = jax.random.split(key, 4)

    predicted_heatmap = jax.random.normal(k1, (B, NC, H, W), jnp.float32)
    predicted_regr = jax.random.normal(k2, (B, Cr, H, W), jnp.float32)
    # target heatmap in [0, 0.9) with a few exact-1.0 "center" pixels
    target_heatmap = jax.random.uniform(k3, (B, NC, H, W), jnp.float32,
                                        minval=0.0, maxval=0.9)
    target_heatmap = target_heatmap.at[:, 0, 4, 4].set(1.0)
    target_heatmap = target_heatmap.at[:, 0, 10, 12].set(1.0)
    target_regr = jax.random.normal(k4, (B, Cr, H, W), jnp.float32)

    out = center_loss(predicted_heatmap, predicted_regr,
                      target_heatmap, target_regr)
    out = jax.block_until_ready(out)

    ref = _reference(predicted_heatmap, predicted_regr,
                     target_heatmap, target_regr)
    for a, b in zip(out, ref):
        assert jnp.allclose(a, b, rtol=1e-4, atol=1e-4), (a, b)

    print("KERNEL_OK")
</pallas_src>

<mosaic_0001>
module attributes {stable_mosaic.version = 11 : i64} {
  func.func @kernel(%arg0: i32, %arg1: memref<2x2x128xf32, #tpu.memory_space<vmem>>, %arg2: memref<2x2x128xf32, #tpu.memory_space<vmem>>, %arg3: memref<2x2x2x128xf32, #tpu.memory_space<vmem>>, %arg4: memref<2x2x2x128xf32, #tpu.memory_space<vmem>>, %arg5: memref<5x2x2x128xf32, #tpu.memory_space<vmem>>) attributes {dimension_semantics = [#tpu.dimension_semantics<arbitrary>], iteration_bounds = array<i64: 1>, scalar_prefetch = 0 : i64, scratch_operands = 0 : i64, tpu.core_type = #tpu.core_type<tc>, window_params = [{transform_indices = @transform_0, window_bounds = array<i64: 2, 2, 128>}, {transform_indices = @transform_1, window_bounds = array<i64: 2, 2, 128>}, {transform_indices = @transform_2, window_bounds = array<i64: 2, 2, 2, 128>}, {transform_indices = @transform_3, window_bounds = array<i64: 2, 2, 2, 128>}, {pipeline_mode = #tpu.pipeline_mode<synchronous>, transform_indices = @transform_4, window_bounds = array<i64: 5, 2, 2, 128>}]} {
    %c0_i32 = arith.constant 0 : i32
    %0 = arith.cmpi eq, %arg0, %c0_i32 : i32
    %1 = arith.extui %0 : i1 to i32
    %c0_i32_0 = arith.constant 0 : i32
    %2 = arith.cmpi ne, %1, %c0_i32_0 : i32
    scf.if %2 {
      %cst_62 = arith.constant 0.000000e+00 : f32
      %81 = vector.broadcast %cst_62 : f32 to vector<5x2x2x128xf32>
      %c0_63 = arith.constant 0 : index
      %c0_64 = arith.constant 0 : index
      %c0_65 = arith.constant 0 : index
      %c0_66 = arith.constant 0 : index
      %82 = vector.load %arg5[%c0_63, %c0_64, %c0_65, %c0_66] : memref<5x2x2x128xf32, #tpu.memory_space<vmem>>, vector<5x2x2x128xf32>
      tpu.vector_store %arg5[%c0_63, %c0_64, %c0_65, %c0_66], %81 {strides = array<i32>} : memref<5x2x2x128xf32, #tpu.memory_space<vmem>>, vector<5x2x2x128xf32>,
    } else {
    }
    %c0 = arith.constant 0 : index
    %c0_1 = arith.constant 0 : index
    %c0_2 = arith.constant 0 : index
    %3 = vector.load %arg1[%c0, %c0_1, %c0_2] : memref<2x2x128xf32, #tpu.memory_space<vmem>>, vector<2x2x128xf32>
    %c0_3 = arith.constant 0 : index
    %c0_4 = arith.constant 0 : index
    %c0_5 = arith.constant 0 : index
    %4 = vector.load %arg2[%c0_3, %c0_4, %c0_5] : memref<2x2x128xf32, #tpu.memory_space<vmem>>, vector<2x2x128xf32>
    %c0_6 = arith.constant 0 : index
    %c0_7 = arith.constant 0 : index
    %c0_8 = arith.constant 0 : index
    %c0_9 = arith.constant 0 : index
    %5 = vector.load %arg3[%c0_6, %c0_7, %c0_8, %c0_9] : memref<2x2x2x128xf32, #tpu.memory_space<vmem>>, vector<2x2x2x128xf32>
    %c0_10 = arith.constant 0 : index
    %c0_11 = arith.constant 0 : index
    %c0_12 = arith.constant 0 : index
    %c0_13 = arith.constant 0 : index
    %6 = vector.load %arg4[%c0_10, %c0_11, %c0_12, %c0_13] : memref<2x2x2x128xf32, #tpu.memory_space<vmem>>, vector<2x2x2x128xf32>
    %7 = arith.subf %5, %6 : vector<2x2x2x128xf32>
    %8 = math.absf %7 : vector<2x2x2x128xf32>
    %cst = arith.constant dense<0.000000e+00> : vector<2x2x128xf32>
    %9 = vector.multi_reduction <add>, %8, %cst [1] : vector<2x2x2x128xf32> to vector<2x2x128xf32>
    %10 = math.absf %3 : vector<2x2x128xf32>
    %cst_14 = arith.constant 0.000000e+00 : f32
    %11 = vector.broadcast %cst_14 : f32 to vector<2x2x128xf32>
    %12 = arith.subf %11, %10 : vector<2x2x128xf32>
    %13 = math.exp %12 : vector<2x2x128xf32>
    %cst_15 = arith.constant 0.000000e+00 : f32
    %14 = vector.broadcast %cst_15 : f32 to vector<2x2x128xf32>
    %15 = arith.subf %14, %3 : vector<2x2x128xf32>
    %cst_16 = arith.constant 0.000000e+00 : f32
    %16 = vector.broadcast %cst_16 : f32 to vector<2x2x128xf32>
    %17 = arith.maximumf %15, %16 : vector<2x2x128xf32>
    %cst_17 = arith.constant 1.000000e+00 : f32
    %18 = vector.broadcast %cst_17 : f32 to vector<2x2x128xf32>
    %19 = arith.addf %18, %13 : vector<2x2x128xf32>
    %20 = math.log %19 : vector<2x2x128xf32>
    %21 = arith.addf %17, %20 : vector<2x2x128xf32>
    %cst_18 = arith.constant 0.000000e+00 : f32
    %22 = vector.broadcast %cst_18 : f32 to vector<2x2x128xf32>
    %23 = arith.subf %22, %21 : vector<2x2x128xf32>
    %cst_19 = arith.constant 0.000000e+00 : f32
    %24 = vector.broadcast %cst_19 : f32 to vector<2x2x128xf32>
    %25 = arith.subf %24, %3 : vector<2x2x128xf32>
    %26 = arith.subf %25, %21 : vector<2x2x128xf32>
    %27 = math.exp %23 : vector<2x2x128xf32>
    %cst_20 = arith.constant 1.000000e+00 : f32
    %28 = vector.broadcast %cst_20 : f32 to vector<2x2x128xf32>
    %29 = arith.cmpf oeq, %4, %28 : vector<2x2x128xf32>
    %cst_21 = arith.constant 1.000000e+00 : f32
    %30 = vector.broadcast %cst_21 : f32 to vector<2x2x128xf32>
    %31 = arith.cmpf olt, %4, %30 : vector<2x2x128xf32>
    %cst_22 = arith.constant 1.000000e+00 : f32
    %32 = vector.broadcast %cst_22 : f32 to vector<2x2x128xf32>
    %33 = arith.subf %32, %27 : vector<2x2x128xf32>
    %cst_23 = arith.constant 1.000000e+00 : f32
    %34 = vector.broadcast %cst_23 : f32 to vector<2x2x128xf32>
    %35 = arith.subf %34, %4 : vector<2x2x128xf32>
    %36 = arith.mulf %35, %35 : vector<2x2x128xf32>
    %37 = arith.mulf %35, %35 : vector<2x2x128xf32>
    %38 = arith.mulf %36, %37 : vector<2x2x128xf32>
    %39 = arith.mulf %23, %33 : vector<2x2x128xf32>
    %40 = arith.mulf %39, %33 : vector<2x2x128xf32>
    %cst_24 = arith.constant 0.000000e+00 : f32
    %41 = vector.broadcast %cst_24 : f32 to vector<2x2x128xf32>
    %42 = arith.select %29, %40, %41 : vector<2x2x128xi1>, vector<2x2x128xf32>
    %43 = arith.mulf %27, %27 : vector<2x2x128xf32>
    %44 = arith.mulf %26, %43 : vector<2x2x128xf32>
    %45 = arith.mulf %44, %38 : vector<2x2x128xf32>
    %cst_25 = arith.constant 0.000000e+00 : f32
    %46 = vector.broadcast %cst_25 : f32 to vector<2x2x128xf32>
    %47 = arith.select %31, %45, %46 : vector<2x2x128xi1>, vector<2x2x128xf32>
    %48 = arith.mulf %9, %4 : vector<2x2x128xf32>
    %c0_26 = arith.constant 0 : index
    %c0_27 = arith.constant 0 : index
    %c0_28 = arith.constant 0 : index
    %c0_29 = arith.constant 0 : index
    %49 = vector.load %arg5[%c0_26, %c0_27, %c0_28, %c0_29] : memref<5x2x2x128xf32, #tpu.memory_space<vmem>>, vector<1x2x2x128xf32>
    %50 = vector.shape_cast %49 : vector<1x2x2x128xf32> to vector<2x2x128xf32>
    %51 = arith.addf %50, %42 : vector<2x2x128xf32>
    %c0_30 = arith.constant 0 : index
    %c0_31 = arith.constant 0 : index
    %c0_32 = arith.constant 0 : index
    %c0_33 = arith.constant 0 : index
    %52 = vector.load %arg5[%c0_30, %c0_31, %c0_32, %c0_33] : memref<5x2x2x128xf32, #tpu.memory_space<vmem>>, vector<1x2x2x128xf32>
    %53 = vector.shape_cast %52 : vector<1x2x2x128xf32> to vector<2x2x128xf32>
    %54 = vector.shape_cast %51 : vector<2x2x128xf32> to vector<1x2x2x128xf32>
    tpu.vector_store %arg5[%c0_30, %c0_31, %c0_32, %c0_33], %54 {strides = array<i32>} : memref<5x2x2x128xf32, #tpu.memory_space<vmem>>, vector<1x2x2x128xf32>,
    %c1 = arith.constant 1 : index
    %c0_34 = arith.constant 0 : index
    %c0_35 = arith.constant 0 : index
    %c0_36 = arith.constant 0 : index
    %55 = vector.load %arg5[%c1, %c0_34, %c0_35, %c0_36] : memref<5x2x2x128xf32, #tpu.memory_space<vmem>>, vector<1x2x2x128xf32>
    %56 = vector.shape_cast %55 : vector<1x2x2x128xf32> to vector<2x2x128xf32>
    %57 = arith.addf %56, %47 : vector<2x2x128xf32>
    %c1_37 = arith.constant 1 : index
    %c0_38 = arith.constant 0 : index
    %c0_39 = arith.constant 0 : index
    %c0_40 = arith.constant 0 : index
    %58 = vector.load %arg5[%c1_37, %c0_38, %c0_39, %c0_40] : memref<5x2x2x128xf32, #tpu.memory_space<vmem>>, vector<1x2x2x128xf32>
    %59 = vector.shape_cast %58 : vector<1x2x2x128xf32> to vector<2x2x128xf32>
    %60 = vector.shape_cast %57 : vector<2x2x128xf32> to vector<1x2x2x128xf32>
    tpu.vector_store %arg5[%c1_37, %c0_38, %c0_39, %c0_40], %60 {strides = array<i32>} : memref<5x2x2x128xf32, #tpu.memory_space<vmem>>, vector<1x2x2x128xf32>,
    %61 = arith.extui %29 : vector<2x2x128xi1> to vector<2x2x128xi32>
    %62 = arith.sitofp %61 : vector<2x2x128xi32> to vector<2x2x128xf32>
    %c2 = arith.constant 2 : index
    %c0_41 = arith.constant 0 : index
    %c0_42 = arith.constant 0 : index
    %c0_43 = arith.constant 0 : index
    %63 = vector.load %arg5[%c2, %c0_41, %c0_42, %c0_43] : memref<5x2x2x128xf32, #tpu.memory_space<vmem>>, vector<1x2x2x128xf32>
    %64 = vector.shape_cast %63 : vector<1x2x2x128xf32> to vector<2x2x128xf32>
    %65 = arith.addf %64, %62 : vector<2x2x128xf32>
    %c2_44 = arith.constant 2 : index
    %c0_45 = arith.constant 0 : index
    %c0_46 = arith.constant 0 : index
    %c0_47 = arith.constant 0 : index
    %66 = vector.load %arg5[%c2_44, %c0_45, %c0_46, %c0_47] : memref<5x2x2x128xf32, #tpu.memory_space<vmem>>, vector<1x2x2x128xf32>
    %67 = vector.shape_cast %66 : vector<1x2x2x128xf32> to vector<2x2x128xf32>
    %68 = vector.shape_cast %65 : vector<2x2x128xf32> to vector<1x2x2x128xf32>
    tpu.vector_store %arg5[%c2_44, %c0_45, %c0_46, %c0_47], %68 {strides = array<i32>} : memref<5x2x2x128xf32, #tpu.memory_space<vmem>>, vector<1x2x2x128xf32>,
    %c3 = arith.constant 3 : index
    %c0_48 = arith.constant 0 : index
    %c0_49 = arith.constant 0 : index
    %c0_50 = arith.constant 0 : index
    %69 = vector.load %arg5[%c3, %c0_48, %c0_49, %c0_50] : memref<5x2x2x128xf32, #tpu.memory_space<vmem>>, vector<1x2x2x128xf32>
    %70 = vector.shape_cast %69 : vector<1x2x2x128xf32> to vector<2x2x128xf32>
    %71 = arith.addf %70, %48 : vector<2x2x128xf32>
    %c3_51 = arith.constant 3 : index
    %c0_52 = arith.constant 0 : index
    %c0_53 = arith.constant 0 : index
    %c0_54 = arith.constant 0 : index
    %72 = vector.load %arg5[%c3_51, %c0_52, %c0_53, %c0_54] : memref<5x2x2x128xf32, #tpu.memory_space<vmem>>, vector<1x2x2x128xf32>
    %73 = vector.shape_cast %72 : vector<1x2x2x128xf32> to vector<2x2x128xf32>
    %74 = vector.shape_cast %71 : vector<2x2x128xf32> to vector<1x2x2x128xf32>
    tpu.vector_store %arg5[%c3_51, %c0_52, %c0_53, %c0_54], %74 {strides = array<i32>} : memref<5x2x2x128xf32, #tpu.memory_space<vmem>>, vector<1x2x2x128xf32>,
    %c4 = arith.constant 4 : index
    %c0_55 = arith.constant 0 : index
    %c0_56 = arith.constant 0 : index
    %c0_57 = arith.constant 0 : index
    %75 = vector.load %arg5[%c4, %c0_55, %c0_56, %c0_57] : memref<5x2x2x128xf32, #tpu.memory_space<vmem>>, vector<1x2x2x128xf32>
    %76 = vector.shape_cast %75 : vector<1x2x2x128xf32> to vector<2x2x128xf32>
    %77 = arith.addf %76, %4 : vector<2x2x128xf32>
    %c4_58 = arith.constant 4 : index
    %c0_59 = arith.constant 0 : index
    %c0_60 = arith.constant 0 : index
    %c0_61 = arith.constant 0 : index
    %78 = vector.load %arg5[%c4_58, %c0_59, %c0_60, %c0_61] : memref<5x2x2x128xf32, #tpu.memory_space<vmem>>, vector<1x2x2x128xf32>
    %79 = vector.shape_cast %78 : vector<1x2x2x128xf32> to vector<2x2x128xf32>
    %80 = vector.shape_cast %77 : vector<2x2x128xf32> to vector<1x2x2x128xf32>
    tpu.vector_store %arg5[%c4_58, %c0_59, %c0_60, %c0_61], %80 {strides = array<i32>} : memref<5x2x2x128xf32, #tpu.memory_space<vmem>>, vector<1x2x2x128xf32>,
    return
  }
  func.func @transform_0(%arg0: i32) -> (i32, i32, i32) {
    %c0_i32 = arith.constant 0 : i32
    %c0_i32_0 = arith.constant 0 : i32
    %c0_i32_1 = arith.constant 0 : i32
    return %c0_i32, %arg0, %c0_i32_0 : i32, i32, i32
  }
  func.func @transform_1(%arg0: i32) -> (i32, i32, i32) {
    %c0_i32 = arith.constant 0 : i32
    %c0_i32_0 = arith.constant 0 : i32
    %c0_i32_1 = arith.constant 0 : i32
    return %c0_i32, %arg0, %c0_i32_0 : i32, i32, i32
  }
  func.func @transform_2(%arg0: i32) -> (i32, i32, i32, i32) {
    %c0_i32 = arith.constant 0 : i32
    %c0_i32_0 = arith.constant 0 : i32
    %c0_i32_1 = arith.constant 0 : i32
    %c0_i32_2 = arith.constant 0 : i32
    return %c0_i32, %c0_i32_0, %arg0, %c0_i32_1 : i32, i32, i32, i32
  }
  func.func @transform_3(%arg0: i32) -> (i32, i32, i32, i32) {
    %c0_i32 = arith.constant 0 : i32
    %c0_i32_0 = arith.constant 0 : i32
    %c0_i32_1 = arith.constant 0 : i32
    %c0_i32_2 = arith.constant 0 : i32
    return %c0_i32, %c0_i32_0, %arg0, %c0_i32_1 : i32, i32, i32, i32
  }
  func.func @transform_4(%arg0: i32) -> (i32, i32, i32, i32) {
    %c0_i32 = arith.constant 0 : i32
    %c0_i32_0 = arith.constant 0 : i32
    %c0_i32_1 = arith.constant 0 : i32
    %c0_i32_2 = arith.constant 0 : i32
    %c0_i32_3 = arith.constant 0 : i32
    return %c0_i32, %c0_i32_0, %c0_i32_1, %c0_i32_2 : i32, i32, i32, i32
  }
}

</mosaic_0001>

<bundles_post_ra>
// kernel: center_loss.1
= control target key start
LH: loop header
LB: loop body
LE: loop exit
PB: predicated region body
PF: predicated region fallthrough
CT: control target
= control target key end

     0   :  { %v187_v0 = vmov 0.0   ;;  %vm51_vm2 = vcmask 1041408   ;;  %s373_s4 = inlined_call_operand.vmem [shape: f32[5,2,2,128], index: 4, kind: output, shape index: {}]   ;;  %s374_s0 = inlined_call_operand.vmem [shape: f32[2,2,128], index: 0, kind: input, shape index: {}]   ;;  %s375_s1 = inlined_call_operand.vmem [shape: f32[2,2,128], index: 1, kind: input, shape index: {}]   ;;  %s376_s2 = inlined_call_operand.vmem [shape: f32[2,2,2,128], index: 2, kind: input, shape index: {}]   ;;  %s377_s3 = inlined_call_operand.vmem [shape: f32[2,2,2,128], index: 3, kind: input, shape index: {}]  }
   0x1   :  { %21 = vst [vmem:[%s373_s4] sm:$0x3] %v187_v0  ;;  %22 = vst [vmem:[%s373_s4 + $0x2] sm:$0x3] %v187_v0  ;;  %v246_v1 = vld [vmem:[%s374_s0] sm:$0x3] }
   0x2   :  { %23 = vst [vmem:[%s373_s4 + $0x4] sm:$0x3] %v187_v0  ;;  %24 = vst [vmem:[%s373_s4 + $0x6] sm:$0x3] %v187_v0  ;;  %v251_v2 = vld [vmem:[%s374_s0 + $0x2] sm:$0x3] }
   0x3   :  { %25 = vst [vmem:[%s373_s4 + $0x8] sm:$0x3] %v187_v0  ;;  %26 = vst [vmem:[%s373_s4 + $0xa] sm:$0x3] %v187_v0  ;;  %v58_v3 = vand.u32 2147483647, %v246_v1 }
   0x4   :  { %27 = vst [vmem:[%s373_s4 + $0xc] sm:$0x3] %v187_v0  ;;  %28 = vst [vmem:[%s373_s4 + $0xe] sm:$0x3] %v187_v0  ;;  %v257_v4 = vld [vmem:[%s375_s1] sm:$0x3] }
   0x5   :  { %29 = vst [vmem:[%s373_s4 + $0x10] sm:$0x3] %v187_v0  ;;  %30 = vst [vmem:[%s373_s4 + $0x12] sm:$0x3] %v187_v0  ;;  %v262_v5 = vld [vmem:[%s375_s1 + $0x2] sm:$0x3] }
   0x6   :  { %v59_v6 = vand.u32 2147483647, %v251_v2  ;;  %v60_v7 = vsub.f32 0.0, %v58_v3  ;;  %vm86_vm0 = vcmp.eq.f32.partialorder %v257_v4, 1.0  ;;  %vm87_vm1 = vcmp.eq.f32.partialorder %v262_v5, 1.0 }
   0x7   :  { %v35_v8 = vld [vmem:[%s376_s2] sm:$0x3]  ;;  %v36_v10 = vld [vmem:[%s376_s2 + $0x2] sm:$0x3]  ;;  %v160_v14 = vsel %vm86_vm0, 1.0, %v187_v0  ;;  %v161_v15 = vsel %vm87_vm1, 1.0, %v187_v0 }
   0x8   :  { %v61_v9 = vsub.f32 0.0, %v59_v6  ;;  %v62_v11 = vmul.f32 1.442695, %v60_v7  ;;  %v39_v12 = vld [vmem:[%s377_s3] sm:$0x3]  ;;  %v66_v53 = vsub.f32 0.0, %v246_v1 }
   0x9   :  { %v40_v16 = vld [vmem:[%s377_s3 + $0x2] sm:$0x3]  ;;  %v43_v17 = vsub.f32 %v35_v8, %v39_v12  ;;  %v37_v21 = vld [vmem:[%s376_s2 + $0x4] sm:$0x3]  ;;  %v38_v26 = vld [vmem:[%s376_s2 + $0x6] sm:$0x3] }
   0xa   :  { %v64_v13 = vmul.f32 1.442695, %v61_v9  ;;  %175 = vpow2.f32 %v62_v11  ;;  %v44_v18 = vsub.f32 %v36_v10, %v40_v16  ;;  %v162_v19 = vld [vmem:[%s373_s4 + $0x8] sm:$0x3]  ;;  %v163_v20 = vld [vmem:[%s373_s4 + $0xa] sm:$0x3] }
   0xb   :  { %v134_v22 = vadd.f32 %v162_v19, %v160_v14  ;;  %v135_v23 = vadd.f32 %v163_v20, %v161_v15  ;;  %v47_v24 = vand.u32 2147483647, %v43_v17  ;;  %v41_v27 = vld [vmem:[%s377_s3 + $0x4] sm:$0x3]  ;;  %v42_v28 = vld [vmem:[%s377_s3 + $0x6] sm:$0x3] }
   0xc   :  { %177 = vpow2.f32 %v64_v13  ;;  %v48_v25 = vand.u32 2147483647, %v44_v18  ;;  %v45_v31 = vsub.f32 %v37_v21, %v41_v27  ;;  %v46_v32 = vsub.f32 %v38_v26, %v42_v28  ;;  %v170_v33 = vld [vmem:[%s373_s4 + $0x10] sm:$0x3]  ;;  %v171_v36 = vld [vmem:[%s373_s4 + $0x12] sm:$0x3] }
   0xd   :  { %164 = vst [vmem:[%s373_s4 + $0x8] sm:$0x3] %v134_v22  ;;  %165 = vst [vmem:[%s373_s4 + $0xa] sm:$0x3] %v135_v23  ;;  %v52_v29 = vsel %vm51_vm2, %v47_v24, 0.0  ;;  %v148_v35 = vadd.f32 %v170_v33, %v257_v4  ;;  %v149_v40 = vadd.f32 %v171_v36, %v262_v5  ;;  %v67_v54 = vsub.f32 0.0, %v251_v2 }
   0xe   :  { %v53_v30 = vsel %vm51_vm2, %v48_v25, 0.0  ;;  %v166_v37 = vld [vmem:[%s373_s4 + $0xc] sm:$0x3]  ;;  %v49_v38 = vand.u32 2147483647, %v45_v31  ;;  %v68_v55 = vmax.f32 %v66_v53, 0.0 }
   0xf   :  { %v54_v34 = vadd.f32 %v53_v30, %v52_v29  ;;  %v50_v39 = vand.u32 2147483647, %v46_v32  ;;  %172 = vst [vmem:[%s373_s4 + $0x10] sm:$0x3] %v148_v35  ;;  %173 = vst [vmem:[%s373_s4 + $0x12] sm:$0x3] %v149_v40 }
  0x10   :  { %v55_v42 = vsel %vm51_vm2, %v49_v38, 0.0  ;;  %v167_v46 = vld [vmem:[%s373_s4 + $0xe] sm:$0x3]  ;;  %v69_v57 = vmax.f32 %v67_v54, 0.0  ;;  %v92_v7 = vsub.f32 1.0, %v257_v4  ;;  %v93_v1 = vsub.f32 1.0, %v262_v5 }
  0x11   :  { %v112_v41 = vmul.f32 %v54_v34, %v257_v4  ;;  %v56_v43 = vsel %vm51_vm2, %v50_v39, 0.0  ;;  %vm88_vm3 = vcmp.lt.f32.partialorder %v257_v4, 1.0  ;;  %v114_v24 = vld [vmem:[%s373_s4] sm:$0x3]  ;;  %v156_v26 = vld [vmem:[%s373_s4 + $0x4] sm:$0x3] }
  0x12   :  { %v57_v45 = vadd.f32 %v56_v43, %v55_v42  ;;  %v94_v8 = vmul.f32 %v92_v7, %v92_v7  ;;  %v95_v2 = vmul.f32 %v93_v1, %v93_v1  ;;  %vm89_vm4 = vcmp.lt.f32.partialorder %v262_v5, 1.0  ;;  %v115_v28 = vld [vmem:[%s373_s4 + $0x2] sm:$0x3]  ;;  %v157_v30 = vld [vmem:[%s373_s4 + $0x6] sm:$0x3] }
  0x13   :  { %v141_v44 = vadd.f32 %v166_v37, %v112_v41 }
  0x14   :  { %v113_v47 = vmul.f32 %v57_v45, %v262_v5  ;;  %v96_v14 = vmul.f32 %v94_v8, %v94_v8  ;;  %v97_v17 = vmul.f32 %v95_v2, %v95_v2 }
  0x15   :  { %168 = vst [vmem:[%s373_s4 + $0xc] sm:$0x3] %v141_v44 }
  0x16   :  { %v142_v49 = vadd.f32 %v167_v46, %v113_v47 }
  0x17   :  { %v176_v48 = vpop.eup %175 }
  0x18   :  { %v70_v51 = vadd.f32 1.0, %v176_v48  ;;  %169 = vst [vmem:[%s373_s4 + $0xe] sm:$0x3] %v142_v49 }
  0x19   :  { %v178_v50 = vpop.eup %177 }
  0x1a   :  { %v71_v52 = vadd.f32 1.0, %v178_v50  ;;  %179 = vlog2.f32 %v70_v51 }
  0x1c   :  { %181 = vlog2.f32 %v71_v52 }
  0x27   :  { %v180_v56 = vpop.eup %179 }
  0x28   :  { %v73_v59 = vmul.f32 0.6931472, %v180_v56 }
  0x29   :  { %v182_v58 = vpop.eup %181 }
  0x2a   :  { %v75_v60 = vmul.f32 0.6931472, %v182_v58  ;;  %v76_v61 = vadd.f32 %v73_v59, %v68_v55 }
  0x2c   :  { %v77_v62 = vadd.f32 %v75_v60, %v69_v57  ;;  %v78_v63 = vsub.f32 0.0, %v76_v61  ;;  %v80_v9 = vsub.f32 %v66_v53, %v76_v61 }
  0x2e   :  { %v79_v0 = vsub.f32 0.0, %v77_v62  ;;  %v82_v3 = vmul.f32 1.442695, %v78_v63  ;;  %v81_v11 = vsub.f32 %v67_v54, %v77_v62 }
  0x30   :  { %v84_v6 = vmul.f32 1.442695, %v79_v0  ;;  %183 = vpow2.f32 %v82_v3 }
  0x32   :  { %185 = vpow2.f32 %v84_v6 }
  0x3d   :  { %v184_v10 = vpop.eup %183 }
  0x3e   :  { %v90_v13 = vsub.f32 1.0, %v184_v10  ;;  %v104_v15 = vmul.f32 %v184_v10, %v184_v10 }
  0x3f   :  { %v186_v12 = vpop.eup %185 }
  0x40   :  { %v91_v16 = vsub.f32 1.0, %v186_v12  ;;  %v105_v18 = vmul.f32 %v186_v12, %v186_v12  ;;  %v98_v19 = vmul.f32 %v90_v13, %v78_v63  ;;  %v106_v20 = vmul.f32 %v104_v15, %v80_v9 }
  0x42   :  { %v99_v21 = vmul.f32 %v91_v16, %v79_v0  ;;  %v107_v22 = vmul.f32 %v105_v18, %v81_v11  ;;  %v100_v23 = vmul.f32 %v98_v19, %v90_v13  ;;  %v108_v25 = vmul.f32 %v106_v20, %v96_v14 }
  0x44   :  { %v101_v27 = vmul.f32 %v99_v21, %v91_v16  ;;  %v109_v29 = vmul.f32 %v107_v22, %v97_v17  ;;  %v102_v31 = vsel %vm86_vm0, %v100_v23, 0.0  ;;  %v110_v32 = vsel %vm88_vm3, %v108_v25, 0.0 }
  0x45   :  { %v116_v33 = vadd.f32 %v114_v24, %v102_v31  ;;  %v123_v35 = vadd.f32 %v156_v26, %v110_v32 }
  0x46   :  { %v103_v34 = vsel %vm87_vm1, %v101_v27, 0.0  ;;  %v111_v36 = vsel %vm89_vm4, %v109_v29, 0.0 }
  0x47   :  { %v117_v37 = vadd.f32 %v115_v28, %v103_v34  ;;  %v124_v38 = vadd.f32 %v157_v30, %v111_v36  ;;  %118 = vst [vmem:[%s373_s4] sm:$0x3] %v116_v33  ;;  %158 = vst [vmem:[%s373_s4 + $0x4] sm:$0x3] %v123_v35 }
  0x49   :  { %119 = vst [vmem:[%s373_s4 + $0x2] sm:$0x3] %v117_v37  ;;  %159 = vst [vmem:[%s373_s4 + $0x6] sm:$0x3] %v124_v38 }

</bundles_post_ra>
